<compile_context>
chip_gen: v5e
topology: v5e:2x2
jax: 0.10.0
libtpu: 0.0.40
codegen_flags: <defaults>
</compile_context>

<pallas_src>
import functools

import jax
import jax.numpy as jnp
from jax.experimental import pallas as pl
from jax.experimental.pallas import tpu as pltpu

INIT_RANGE = 0.5
EPSILON = 1e-10


def _round_up(x, m):
    return ((x + m - 1) // m) * m


def _disjunction_kernel(x_ref, wt_ref, o_ref, *, chunk):
    """o = 1 - (-1 / (-1 + sum_i log(1 - x[:, i, None] * wt[None, i, :]))).

    x_ref : (tile_b, D)       batch tile of x, full (possibly use_not-doubled) input dim
    wt_ref: (D, tile_n)       tile of W^T (lane axis carries the n output nodes)
    o_ref : (tile_b, tile_n)
    """
    tb, D = x_ref.shape
    tn = wt_ref.shape[1]

    x = x_ref[...]                                      # (tb, D), loaded once

    log_sum = jnp.zeros((tb, tn), dtype=jnp.float32)
    for c0 in range(0, D, chunk):
        c1 = min(c0 + chunk, D)
        # Running elementwise product over this D-chunk -> one log per chunk.
        # Factors are in (0, 1] for the module's clipped weights / [0,1] inputs,
        # so a chunk of <= 64 factors stays comfortably inside f32 normal range.
        prod = jnp.ones((tb, tn), dtype=jnp.float32)
        for i in range(c0, c1):
            xi = x[:, i:i + 1]                          # (tb, 1) column (static slice)
            wi = wt_ref[i:i + 1, :]                     # (1, tn) lane-dense row
            prod = prod * (1.0 - xi * wi)               # VPU broadcast-multiply
        # NOTE: like the PyTorch reference, behaviour is undefined if any factor
        # <= 0 (x*W >= 1); DisjunctionLayer.clip() keeps W in [0, 1].
        log_sum = log_sum + jnp.log(prod)               # one EUP log per chunk

    y = -1.0 / (-1.0 + log_sum)                         # Product.forward surrogate
    o_ref[...] = 1.0 - y


def disjunction_forward(x, W, use_not=False, *, tile_b=256, tile_n=512, chunk=64):
    """Forward pass of DisjunctionLayer.

    x: (B, input_dim) float32
    W: (n, eff_input_dim) float32 with eff = 2*input_dim if use_not else input_dim.
    Returns (B, n) float32.
    """
    x = jnp.asarray(x, jnp.float32)
    W = jnp.asarray(W, jnp.float32)
    if use_not:
        x = jnp.concatenate([x, 1.0 - x], axis=1)       # matches torch.cat((x, 1-x), 1)

    B, D = x.shape
    N, Dw = W.shape
    assert D == Dw, (D, Dw)

    # --- lane-dense n axis: pad to a multiple of 128 and pick the n tile ---
    tn = _round_up(min(tile_n, _round_up(N, 128)), 128)
    N_pad = _round_up(N, tn)

    # --- batch tiling: tile_b multiple of 8; keep >= 2 batch grid steps if possible ---
    tb = max(8, _round_up(min(tile_b, 512), 8))
    if _round_up(B, 8) <= tb:
        tb = max(8, min(tb, _round_up(pl.cdiv(B, 2), 8)))
    B_pad = _round_up(B, tb)

    # Zero padding is semantically inert: padded x rows / padded W columns give
    # factors of exactly 1 (log 0); padded output columns are sliced away below.
    x_p = jnp.zeros((B_pad, D), jnp.float32).at[:B, :].set(x)
    wt = jnp.zeros((D, N_pad), jnp.float32).at[:, :N].set(W.T)

    grid = (B_pad // tb, N_pad // tn)
    n_chunks = pl.cdiv(D, chunk)

    out = pl.pallas_call(
        functools.partial(_disjunction_kernel, chunk=chunk),
        out_shape=jax.ShapeDtypeStruct((B_pad, N_pad), jnp.float32),
        grid_spec=pltpu.PrefetchScalarGridSpec(
            num_scalar_prefetch=0,
            grid=grid,
            in_specs=[
                pl.BlockSpec((tb, D), lambda i, j: (i, 0)),     # batch tile of x
                pl.BlockSpec((D, tn), lambda i, j: (0, j)),     # n tile of W^T
            ],
            out_specs=pl.BlockSpec((tb, tn), lambda i, j: (i, j)),
        ),
        compiler_params=pltpu.CompilerParams(
            dimension_semantics=("parallel", "parallel"),
        ),
        cost_estimate=pl.CostEstimate(
            flops=3 * B_pad * D * N_pad + 4 * B_pad * N_pad,
            transcendentals=B_pad * N_pad * n_chunks,
            bytes_accessed=4 * (B_pad * D + D * N_pad + B_pad * N_pad),
        ),
    )(x_p, wt)
    return out[:B, :N]


def disjunction_reference(x, W, use_not=False):
    """Pure-JAX reference mirroring the PyTorch forward exactly."""
    x = jnp.asarray(x, jnp.float32)
    W = jnp.asarray(W, jnp.float32)
    if use_not:
        x = jnp.concatenate([x, 1.0 - x], axis=1)
    t = 1.0 - x[:, :, None] * W.T[None, :, :]           # (B, D, N)
    y = -1.0 / (-1.0 + jnp.sum(jnp.log(t), axis=1))     # (B, N)
    return 1.0 - y


if __name__ == "__main__":
    # Small shapes consistent with DisjunctionLayer(n, input_dim).
    n = 8
    input_dim = 32
    batch = 16

    key = jax.random.PRNGKey(0)
    kx, kw1, kw2 = jax.random.split(key, 3)

    x = jax.random.uniform(kx, (batch, input_dim), dtype=jnp.float32)
    W = INIT_RANGE * jax.random.uniform(kw1, (n, input_dim), dtype=jnp.float32)
    W_not = INIT_RANGE * jax.random.uniform(kw2, (n, 2 * input_dim), dtype=jnp.float32)

    ok = True
    for use_not, weights in ((False, W), (True, W_not)):
        out = jax.block_until_ready(disjunction_forward(x, weights, use_not=use_not))
        ref = disjunction_reference(x, weights, use_not=use_not)
        assert out.shape == (batch, n), out.shape
        err = float(jnp.max(jnp.abs(out - ref)))
        assert err < 1e-4, ("mismatch vs reference", use_not, err)

    # TODO(synk): backward (Product/EstimatedProduct custom grads) and
    # binarized_forward/Binarize STE are training-only paths, not implemented here.
    print("KERNEL_OK")
</pallas_src>

<mosaic_0001>
module attributes {stable_mosaic.version = 11 : i64} {
  func.func @_disjunction_kernel(%arg0: i32, %arg1: i32, %arg2: memref<8x32xf32, #tpu.memory_space<vmem>>, %arg3: memref<32x128xf32, #tpu.memory_space<vmem>>, %arg4: memref<8x128xf32, #tpu.memory_space<vmem>>) attributes {dimension_semantics = [#tpu.dimension_semantics<parallel>, #tpu.dimension_semantics<parallel>], iteration_bounds = array<i64: 2, 1>, scalar_prefetch = 0 : i64, scratch_operands = 0 : i64, tpu.core_type = #tpu.core_type<tc>, window_params = [{transform_indices = @transform_0, window_bounds = array<i64: 8, 32>}, {transform_indices = @transform_1, window_bounds = array<i64: 32, 128>}, {transform_indices = @transform_2, window_bounds = array<i64: 8, 128>}]} {
    %c0 = arith.constant 0 : index
    %c0_0 = arith.constant 0 : index
    %0 = vector.load %arg2[%c0, %c0_0] : memref<8x32xf32, #tpu.memory_space<vmem>>, vector<8x32xf32>
    %cst = arith.constant 0.000000e+00 : f32
    %1 = vector.broadcast %cst : f32 to vector<8x128xf32>
    %cst_1 = arith.constant 1.000000e+00 : f32
    %2 = vector.broadcast %cst_1 : f32 to vector<8x128xf32>
    %3 = vector.extract_strided_slice %0 {offsets = [0, 0], sizes = [8, 1], strides = [1, 1]} : vector<8x32xf32> to vector<8x1xf32>
    %c0_2 = arith.constant 0 : index
    %c0_3 = arith.constant 0 : index
    %4 = vector.load %arg3[%c0_2, %c0_3] : memref<32x128xf32, #tpu.memory_space<vmem>>, vector<1x128xf32>
    %5 = vector.broadcast %3 : vector<8x1xf32> to vector<8x128xf32>
    %6 = vector.broadcast %4 : vector<1x128xf32> to vector<8x128xf32>
    %7 = arith.mulf %5, %6 : vector<8x128xf32>
    %cst_4 = arith.constant 1.000000e+00 : f32
    %8 = vector.broadcast %cst_4 : f32 to vector<8x128xf32>
    %9 = arith.subf %8, %7 : vector<8x128xf32>
    %10 = arith.mulf %2, %9 : vector<8x128xf32>
    %11 = vector.extract_strided_slice %0 {offsets = [0, 1], sizes = [8, 1], strides = [1, 1]} : vector<8x32xf32> to vector<8x1xf32>
    %c1 = arith.constant 1 : index
    %c0_5 = arith.constant 0 : index
    %12 = vector.load %arg3[%c1, %c0_5] : memref<32x128xf32, #tpu.memory_space<vmem>>, vector<1x128xf32>
    %13 = vector.broadcast %11 : vector<8x1xf32> to vector<8x128xf32>
    %14 = vector.broadcast %12 : vector<1x128xf32> to vector<8x128xf32>
    %15 = arith.mulf %13, %14 : vector<8x128xf32>
    %cst_6 = arith.constant 1.000000e+00 : f32
    %16 = vector.broadcast %cst_6 : f32 to vector<8x128xf32>
    %17 = arith.subf %16, %15 : vector<8x128xf32>
    %18 = arith.mulf %10, %17 : vector<8x128xf32>
    %19 = vector.extract_strided_slice %0 {offsets = [0, 2], sizes = [8, 1], strides = [1, 1]} : vector<8x32xf32> to vector<8x1xf32>
    %c2 = arith.constant 2 : index
    %c0_7 = arith.constant 0 : index
    %20 = vector.load %arg3[%c2, %c0_7] : memref<32x128xf32, #tpu.memory_space<vmem>>, vector<1x128xf32>
    %21 = vector.broadcast %19 : vector<8x1xf32> to vector<8x128xf32>
    %22 = vector.broadcast %20 : vector<1x128xf32> to vector<8x128xf32>
    %23 = arith.mulf %21, %22 : vector<8x128xf32>
    %cst_8 = arith.constant 1.000000e+00 : f32
    %24 = vector.broadcast %cst_8 : f32 to vector<8x128xf32>
    %25 = arith.subf %24, %23 : vector<8x128xf32>
    %26 = arith.mulf %18, %25 : vector<8x128xf32>
    %27 = vector.extract_strided_slice %0 {offsets = [0, 3], sizes = [8, 1], strides = [1, 1]} : vector<8x32xf32> to vector<8x1xf32>
    %c3 = arith.constant 3 : index
    %c0_9 = arith.constant 0 : index
    %28 = vector.load %arg3[%c3, %c0_9] : memref<32x128xf32, #tpu.memory_space<vmem>>, vector<1x128xf32>
    %29 = vector.broadcast %27 : vector<8x1xf32> to vector<8x128xf32>
    %30 = vector.broadcast %28 : vector<1x128xf32> to vector<8x128xf32>
    %31 = arith.mulf %29, %30 : vector<8x128xf32>
    %cst_10 = arith.constant 1.000000e+00 : f32
    %32 = vector.broadcast %cst_10 : f32 to vector<8x128xf32>
    %33 = arith.subf %32, %31 : vector<8x128xf32>
    %34 = arith.mulf %26, %33 : vector<8x128xf32>
    %35 = vector.extract_strided_slice %0 {offsets = [0, 4], sizes = [8, 1], strides = [1, 1]} : vector<8x32xf32> to vector<8x1xf32>
    %c4 = arith.constant 4 : index
    %c0_11 = arith.constant 0 : index
    %36 = vector.load %arg3[%c4, %c0_11] : memref<32x128xf32, #tpu.memory_space<vmem>>, vector<1x128xf32>
    %37 = vector.broadcast %35 : vector<8x1xf32> to vector<8x128xf32>
    %38 = vector.broadcast %36 : vector<1x128xf32> to vector<8x128xf32>
    %39 = arith.mulf %37, %38 : vector<8x128xf32>
    %cst_12 = arith.constant 1.000000e+00 : f32
    %40 = vector.broadcast %cst_12 : f32 to vector<8x128xf32>
    %41 = arith.subf %40, %39 : vector<8x128xf32>
    %42 = arith.mulf %34, %41 : vector<8x128xf32>
    %43 = vector.extract_strided_slice %0 {offsets = [0, 5], sizes = [8, 1], strides = [1, 1]} : vector<8x32xf32> to vector<8x1xf32>
    %c5 = arith.constant 5 : index
    %c0_13 = arith.constant 0 : index
    %44 = vector.load %arg3[%c5, %c0_13] : memref<32x128xf32, #tpu.memory_space<vmem>>, vector<1x128xf32>
    %45 = vector.broadcast %43 : vector<8x1xf32> to vector<8x128xf32>
    %46 = vector.broadcast %44 : vector<1x128xf32> to vector<8x128xf32>
    %47 = arith.mulf %45, %46 : vector<8x128xf32>
    %cst_14 = arith.constant 1.000000e+00 : f32
    %48 = vector.broadcast %cst_14 : f32 to vector<8x128xf32>
    %49 = arith.subf %48, %47 : vector<8x128xf32>
    %50 = arith.mulf %42, %49 : vector<8x128xf32>
    %51 = vector.extract_strided_slice %0 {offsets = [0, 6], sizes = [8, 1], strides = [1, 1]} : vector<8x32xf32> to vector<8x1xf32>
    %c6 = arith.constant 6 : index
    %c0_15 = arith.constant 0 : index
    %52 = vector.load %arg3[%c6, %c0_15] : memref<32x128xf32, #tpu.memory_space<vmem>>, vector<1x128xf32>
    %53 = vector.broadcast %51 : vector<8x1xf32> to vector<8x128xf32>
    %54 = vector.broadcast %52 : vector<1x128xf32> to vector<8x128xf32>
    %55 = arith.mulf %53, %54 : vector<8x128xf32>
    %cst_16 = arith.constant 1.000000e+00 : f32
    %56 = vector.broadcast %cst_16 : f32 to vector<8x128xf32>
    %57 = arith.subf %56, %55 : vector<8x128xf32>
    %58 = arith.mulf %50, %57 : vector<8x128xf32>
    %59 = vector.extract_strided_slice %0 {offsets = [0, 7], sizes = [8, 1], strides = [1, 1]} : vector<8x32xf32> to vector<8x1xf32>
    %c7 = arith.constant 7 : index
    %c0_17 = arith.constant 0 : index
    %60 = vector.load %arg3[%c7, %c0_17] : memref<32x128xf32, #tpu.memory_space<vmem>>, vector<1x128xf32>
    %61 = vector.broadcast %59 : vector<8x1xf32> to vector<8x128xf32>
    %62 = vector.broadcast %60 : vector<1x128xf32> to vector<8x128xf32>
    %63 = arith.mulf %61, %62 : vector<8x128xf32>
    %cst_18 = arith.constant 1.000000e+00 : f32
    %64 = vector.broadcast %cst_18 : f32 to vector<8x128xf32>
    %65 = arith.subf %64, %63 : vector<8x128xf32>
    %66 = arith.mulf %58, %65 : vector<8x128xf32>
    %67 = vector.extract_strided_slice %0 {offsets = [0, 8], sizes = [8, 1], strides = [1, 1]} : vector<8x32xf32> to vector<8x1xf32>
    %c8 = arith.constant 8 : index
    %c0_19 = arith.constant 0 : index
    %68 = vector.load %arg3[%c8, %c0_19] : memref<32x128xf32, #tpu.memory_space<vmem>>, vector<1x128xf32>
    %69 = vector.broadcast %67 : vector<8x1xf32> to vector<8x128xf32>
    %70 = vector.broadcast %68 : vector<1x128xf32> to vector<8x128xf32>
    %71 = arith.mulf %69, %70 : vector<8x128xf32>
    %cst_20 = arith.constant 1.000000e+00 : f32
    %72 = vector.broadcast %cst_20 : f32 to vector<8x128xf32>
    %73 = arith.subf %72, %71 : vector<8x128xf32>
    %74 = arith.mulf %66, %73 : vector<8x128xf32>
    %75 = vector.extract_strided_slice %0 {offsets = [0, 9], sizes = [8, 1], strides = [1, 1]} : vector<8x32xf32> to vector<8x1xf32>
    %c9 = arith.constant 9 : index
    %c0_21 = arith.constant 0 : index
    %76 = vector.load %arg3[%c9, %c0_21] : memref<32x128xf32, #tpu.memory_space<vmem>>, vector<1x128xf32>
    %77 = vector.broadcast %75 : vector<8x1xf32> to vector<8x128xf32>
    %78 = vector.broadcast %76 : vector<1x128xf32> to vector<8x128xf32>
    %79 = arith.mulf %77, %78 : vector<8x128xf32>
    %cst_22 = arith.constant 1.000000e+00 : f32
    %80 = vector.broadcast %cst_22 : f32 to vector<8x128xf32>
    %81 = arith.subf %80, %79 : vector<8x128xf32>
    %82 = arith.mulf %74, %81 : vector<8x128xf32>
    %83 = vector.extract_strided_slice %0 {offsets = [0, 10], sizes = [8, 1], strides = [1, 1]} : vector<8x32xf32> to vector<8x1xf32>
    %c10 = arith.constant 10 : index
    %c0_23 = arith.constant 0 : index
    %84 = vector.load %arg3[%c10, %c0_23] : memref<32x128xf32, #tpu.memory_space<vmem>>, vector<1x128xf32>
    %85 = vector.broadcast %83 : vector<8x1xf32> to vector<8x128xf32>
    %86 = vector.broadcast %84 : vector<1x128xf32> to vector<8x128xf32>
    %87 = arith.mulf %85, %86 : vector<8x128xf32>
    %cst_24 = arith.constant 1.000000e+00 : f32
    %88 = vector.broadcast %cst_24 : f32 to vector<8x128xf32>
    %89 = arith.subf %88, %87 : vector<8x128xf32>
    %90 = arith.mulf %82, %89 : vector<8x128xf32>
    %91 = vector.extract_strided_slice %0 {offsets = [0, 11], sizes = [8, 1], strides = [1, 1]} : vector<8x32xf32> to vector<8x1xf32>
    %c11 = arith.constant 11 : index
    %c0_25 = arith.constant 0 : index
    %92 = vector.load %arg3[%c11, %c0_25] : memref<32x128xf32, #tpu.memory_space<vmem>>, vector<1x128xf32>
    %93 = vector.broadcast %91 : vector<8x1xf32> to vector<8x128xf32>
    %94 = vector.broadcast %92 : vector<1x128xf32> to vector<8x128xf32>
    %95 = arith.mulf %93, %94 : vector<8x128xf32>
    %cst_26 = arith.constant 1.000000e+00 : f32
    %96 = vector.broadcast %cst_26 : f32 to vector<8x128xf32>
    %97 = arith.subf %96, %95 : vector<8x128xf32>
    %98 = arith.mulf %90, %97 : vector<8x128xf32>
    %99 = vector.extract_strided_slice %0 {offsets = [0, 12], sizes = [8, 1], strides = [1, 1]} : vector<8x32xf32> to vector<8x1xf32>
    %c12 = arith.constant 12 : index
    %c0_27 = arith.constant 0 : index
    %100 = vector.load %arg3[%c12, %c0_27] : memref<32x128xf32, #tpu.memory_space<vmem>>, vector<1x128xf32>
    %101 = vector.broadcast %99 : vector<8x1xf32> to vector<8x128xf32>
    %102 = vector.broadcast %100 : vector<1x128xf32> to vector<8x128xf32>
    %103 = arith.mulf %101, %102 : vector<8x128xf32>
    %cst_28 = arith.constant 1.000000e+00 : f32
    %104 = vector.broadcast %cst_28 : f32 to vector<8x128xf32>
    %105 = arith.subf %104, %103 : vector<8x128xf32>
    %106 = arith.mulf %98, %105 : vector<8x128xf32>
    %107 = vector.extract_strided_slice %0 {offsets = [0, 13], sizes = [8, 1], strides = [1, 1]} : vector<8x32xf32> to vector<8x1xf32>
    %c13 = arith.constant 13 : index
    %c0_29 = arith.constant 0 : index
    %108 = vector.load %arg3[%c13, %c0_29] : memref<32x128xf32, #tpu.memory_space<vmem>>, vector<1x128xf32>
    %109 = vector.broadcast %107 : vector<8x1xf32> to vector<8x128xf32>
    %110 = vector.broadcast %108 : vector<1x128xf32> to vector<8x128xf32>
    %111 = arith.mulf %109, %110 : vector<8x128xf32>
    %cst_30 = arith.constant 1.000000e+00 : f32
    %112 = vector.broadcast %cst_30 : f32 to vector<8x128xf32>
    %113 = arith.subf %112, %111 : vector<8x128xf32>
    %114 = arith.mulf %106, %113 : vector<8x128xf32>
    %115 = vector.extract_strided_slice %0 {offsets = [0, 14], sizes = [8, 1], strides = [1, 1]} : vector<8x32xf32> to vector<8x1xf32>
    %c14 = arith.constant 14 : index
    %c0_31 = arith.constant 0 : index
    %116 = vector.load %arg3[%c14, %c0_31] : memref<32x128xf32, #tpu.memory_space<vmem>>, vector<1x128xf32>
    %117 = vector.broadcast %115 : vector<8x1xf32> to vector<8x128xf32>
    %118 = vector.broadcast %116 : vector<1x128xf32> to vector<8x128xf32>
    %119 = arith.mulf %117, %118 : vector<8x128xf32>
    %cst_32 = arith.constant 1.000000e+00 : f32
    %120 = vector.broadcast %cst_32 : f32 to vector<8x128xf32>
    %121 = arith.subf %120, %119 : vector<8x128xf32>
    %122 = arith.mulf %114, %121 : vector<8x128xf32>
    %123 = vector.extract_strided_slice %0 {offsets = [0, 15], sizes = [8, 1], strides = [1, 1]} : vector<8x32xf32> to vector<8x1xf32>
    %c15 = arith.constant 15 : index
    %c0_33 = arith.constant 0 : index
    %124 = vector.load %arg3[%c15, %c0_33] : memref<32x128xf32, #tpu.memory_space<vmem>>, vector<1x128xf32>
    %125 = vector.broadcast %123 : vector<8x1xf32> to vector<8x128xf32>
    %126 = vector.broadcast %124 : vector<1x128xf32> to vector<8x128xf32>
    %127 = arith.mulf %125, %126 : vector<8x128xf32>
    %cst_34 = arith.constant 1.000000e+00 : f32
    %128 = vector.broadcast %cst_34 : f32 to vector<8x128xf32>
    %129 = arith.subf %128, %127 : vector<8x128xf32>
    %130 = arith.mulf %122, %129 : vector<8x128xf32>
    %131 = vector.extract_strided_slice %0 {offsets = [0, 16], sizes = [8, 1], strides = [1, 1]} : vector<8x32xf32> to vector<8x1xf32>
    %c16 = arith.constant 16 : index
    %c0_35 = arith.constant 0 : index
    %132 = vector.load %arg3[%c16, %c0_35] : memref<32x128xf32, #tpu.memory_space<vmem>>, vector<1x128xf32>
    %133 = vector.broadcast %131 : vector<8x1xf32> to vector<8x128xf32>
    %134 = vector.broadcast %132 : vector<1x128xf32> to vector<8x128xf32>
    %135 = arith.mulf %133, %134 : vector<8x128xf32>
    %cst_36 = arith.constant 1.000000e+00 : f32
    %136 = vector.broadcast %cst_36 : f32 to vector<8x128xf32>
    %137 = arith.subf %136, %135 : vector<8x128xf32>
    %138 = arith.mulf %130, %137 : vector<8x128xf32>
    %139 = vector.extract_strided_slice %0 {offsets = [0, 17], sizes = [8, 1], strides = [1, 1]} : vector<8x32xf32> to vector<8x1xf32>
    %c17 = arith.constant 17 : index
    %c0_37 = arith.constant 0 : index
    %140 = vector.load %arg3[%c17, %c0_37] : memref<32x128xf32, #tpu.memory_space<vmem>>, vector<1x128xf32>
    %141 = vector.broadcast %139 : vector<8x1xf32> to vector<8x128xf32>
    %142 = vector.broadcast %140 : vector<1x128xf32> to vector<8x128xf32>
    %143 = arith.mulf %141, %142 : vector<8x128xf32>
    %cst_38 = arith.constant 1.000000e+00 : f32
    %144 = vector.broadcast %cst_38 : f32 to vector<8x128xf32>
    %145 = arith.subf %144, %143 : vector<8x128xf32>
    %146 = arith.mulf %138, %145 : vector<8x128xf32>
    %147 = vector.extract_strided_slice %0 {offsets = [0, 18], sizes = [8, 1], strides = [1, 1]} : vector<8x32xf32> to vector<8x1xf32>
    %c18 = arith.constant 18 : index
    %c0_39 = arith.constant 0 : index
    %148 = vector.load %arg3[%c18, %c0_39] : memref<32x128xf32, #tpu.memory_space<vmem>>, vector<1x128xf32>
    %149 = vector.broadcast %147 : vector<8x1xf32> to vector<8x128xf32>
    %150 = vector.broadcast %148 : vector<1x128xf32> to vector<8x128xf32>
    %151 = arith.mulf %149, %150 : vector<8x128xf32>
    %cst_40 = arith.constant 1.000000e+00 : f32
    %152 = vector.broadcast %cst_40 : f32 to vector<8x128xf32>
    %153 = arith.subf %152, %151 : vector<8x128xf32>
    %154 = arith.mulf %146, %153 : vector<8x128xf32>
    %155 = vector.extract_strided_slice %0 {offsets = [0, 19], sizes = [8, 1], strides = [1, 1]} : vector<8x32xf32> to vector<8x1xf32>
    %c19 = arith.constant 19 : index
    %c0_41 = arith.constant 0 : index
    %156 = vector.load %arg3[%c19, %c0_41] : memref<32x128xf32, #tpu.memory_space<vmem>>, vector<1x128xf32>
    %157 = vector.broadcast %155 : vector<8x1xf32> to vector<8x128xf32>
    %158 = vector.broadcast %156 : vector<1x128xf32> to vector<8x128xf32>
    %159 = arith.mulf %157, %158 : vector<8x128xf32>
    %cst_42 = arith.constant 1.000000e+00 : f32
    %160 = vector.broadcast %cst_42 : f32 to vector<8x128xf32>
    %161 = arith.subf %160, %159 : vector<8x128xf32>
    %162 = arith.mulf %154, %161 : vector<8x128xf32>
    %163 = vector.extract_strided_slice %0 {offsets = [0, 20], sizes = [8, 1], strides = [1, 1]} : vector<8x32xf32> to vector<8x1xf32>
    %c20 = arith.constant 20 : index
    %c0_43 = arith.constant 0 : index
    %164 = vector.load %arg3[%c20, %c0_43] : memref<32x128xf32, #tpu.memory_space<vmem>>, vector<1x128xf32>
    %165 = vector.broadcast %163 : vector<8x1xf32> to vector<8x128xf32>
    %166 = vector.broadcast %164 : vector<1x128xf32> to vector<8x128xf32>
    %167 = arith.mulf %165, %166 : vector<8x128xf32>
    %cst_44 = arith.constant 1.000000e+00 : f32
    %168 = vector.broadcast %cst_44 : f32 to vector<8x128xf32>
    %169 = arith.subf %168, %167 : vector<8x128xf32>
    %170 = arith.mulf %162, %169 : vector<8x128xf32>
    %171 = vector.extract_strided_slice %0 {offsets = [0, 21], sizes = [8, 1], strides = [1, 1]} : vector<8x32xf32> to vector<8x1xf32>
    %c21 = arith.constant 21 : index
    %c0_45 = arith.constant 0 : index
    %172 = vector.load %arg3[%c21, %c0_45] : memref<32x128xf32, #tpu.memory_space<vmem>>, vector<1x128xf32>
    %173 = vector.broadcast %171 : vector<8x1xf32> to vector<8x128xf32>
    %174 = vector.broadcast %172 : vector<1x128xf32> to vector<8x128xf32>
    %175 = arith.mulf %173, %174 : vector<8x128xf32>
    %cst_46 = arith.constant 1.000000e+00 : f32
    %176 = vector.broadcast %cst_46 : f32 to vector<8x128xf32>
    %177 = arith.subf %176, %175 : vector<8x128xf32>
    %178 = arith.mulf %170, %177 : vector<8x128xf32>
    %179 = vector.extract_strided_slice %0 {offsets = [0, 22], sizes = [8, 1], strides = [1, 1]} : vector<8x32xf32> to vector<8x1xf32>
    %c22 = arith.constant 22 : index
    %c0_47 = arith.constant 0 : index
    %180 = vector.load %arg3[%c22, %c0_47] : memref<32x128xf32, #tpu.memory_space<vmem>>, vector<1x128xf32>
    %181 = vector.broadcast %179 : vector<8x1xf32> to vector<8x128xf32>
    %182 = vector.broadcast %180 : vector<1x128xf32> to vector<8x128xf32>
    %183 = arith.mulf %181, %182 : vector<8x128xf32>
    %cst_48 = arith.constant 1.000000e+00 : f32
    %184 = vector.broadcast %cst_48 : f32 to vector<8x128xf32>
    %185 = arith.subf %184, %183 : vector<8x128xf32>
    %186 = arith.mulf %178, %185 : vector<8x128xf32>
    %187 = vector.extract_strided_slice %0 {offsets = [0, 23], sizes = [8, 1], strides = [1, 1]} : vector<8x32xf32> to vector<8x1xf32>
    %c23 = arith.constant 23 : index
    %c0_49 = arith.constant 0 : index
    %188 = vector.load %arg3[%c23, %c0_49] : memref<32x128xf32, #tpu.memory_space<vmem>>, vector<1x128xf32>
    %189 = vector.broadcast %187 : vector<8x1xf32> to vector<8x128xf32>
    %190 = vector.broadcast %188 : vector<1x128xf32> to vector<8x128xf32>
    %191 = arith.mulf %189, %190 : vector<8x128xf32>
    %cst_50 = arith.constant 1.000000e+00 : f32
    %192 = vector.broadcast %cst_50 : f32 to vector<8x128xf32>
    %193 = arith.subf %192, %191 : vector<8x128xf32>
    %194 = arith.mulf %186, %193 : vector<8x128xf32>
    %195 = vector.extract_strided_slice %0 {offsets = [0, 24], sizes = [8, 1], strides = [1, 1]} : vector<8x32xf32> to vector<8x1xf32>
    %c24 = arith.constant 24 : index
    %c0_51 = arith.constant 0 : index
    %196 = vector.load %arg3[%c24, %c0_51] : memref<32x128xf32, #tpu.memory_space<vmem>>, vector<1x128xf32>
    %197 = vector.broadcast %195 : vector<8x1xf32> to vector<8x128xf32>
    %198 = vector.broadcast %196 : vector<1x128xf32> to vector<8x128xf32>
    %199 = arith.mulf %197, %198 : vector<8x128xf32>
    %cst_52 = arith.constant 1.000000e+00 : f32
    %200 = vector.broadcast %cst_52 : f32 to vector<8x128xf32>
    %201 = arith.subf %200, %199 : vector<8x128xf32>
    %202 = arith.mulf %194, %201 : vector<8x128xf32>
    %203 = vector.extract_strided_slice %0 {offsets = [0, 25], sizes = [8, 1], strides = [1, 1]} : vector<8x32xf32> to vector<8x1xf32>
    %c25 = arith.constant 25 : index
    %c0_53 = arith.constant 0 : index
    %204 = vector.load %arg3[%c25, %c0_53] : memref<32x128xf32, #tpu.memory_space<vmem>>, vector<1x128xf32>
    %205 = vector.broadcast %203 : vector<8x1xf32> to vector<8x128xf32>
    %206 = vector.broadcast %204 : vector<1x128xf32> to vector<8x128xf32>
    %207 = arith.mulf %205, %206 : vector<8x128xf32>
    %cst_54 = arith.constant 1.000000e+00 : f32
    %208 = vector.broadcast %cst_54 : f32 to vector<8x128xf32>
    %209 = arith.subf %208, %207 : vector<8x128xf32>
    %210 = arith.mulf %202, %209 : vector<8x128xf32>
    %211 = vector.extract_strided_slice %0 {offsets = [0, 26], sizes = [8, 1], strides = [1, 1]} : vector<8x32xf32> to vector<8x1xf32>
    %c26 = arith.constant 26 : index
    %c0_55 = arith.constant 0 : index
    %212 = vector.load %arg3[%c26, %c0_55] : memref<32x128xf32, #tpu.memory_space<vmem>>, vector<1x128xf32>
    %213 = vector.broadcast %211 : vector<8x1xf32> to vector<8x128xf32>
    %214 = vector.broadcast %212 : vector<1x128xf32> to vector<8x128xf32>
    %215 = arith.mulf %213, %214 : vector<8x128xf32>
    %cst_56 = arith.constant 1.000000e+00 : f32
    %216 = vector.broadcast %cst_56 : f32 to vector<8x128xf32>
    %217 = arith.subf %216, %215 : vector<8x128xf32>
    %218 = arith.mulf %210, %217 : vector<8x128xf32>
    %219 = vector.extract_strided_slice %0 {offsets = [0, 27], sizes = [8, 1], strides = [1, 1]} : vector<8x32xf32> to vector<8x1xf32>
    %c27 = arith.constant 27 : index
    %c0_57 = arith.constant 0 : index
    %220 = vector.load %arg3[%c27, %c0_57] : memref<32x128xf32, #tpu.memory_space<vmem>>, vector<1x128xf32>
    %221 = vector.broadcast %219 : vector<8x1xf32> to vector<8x128xf32>
    %222 = vector.broadcast %220 : vector<1x128xf32> to vector<8x128xf32>
    %223 = arith.mulf %221, %222 : vector<8x128xf32>
    %cst_58 = arith.constant 1.000000e+00 : f32
    %224 = vector.broadcast %cst_58 : f32 to vector<8x128xf32>
    %225 = arith.subf %224, %223 : vector<8x128xf32>
    %226 = arith.mulf %218, %225 : vector<8x128xf32>
    %227 = vector.extract_strided_slice %0 {offsets = [0, 28], sizes = [8, 1], strides = [1, 1]} : vector<8x32xf32> to vector<8x1xf32>
    %c28 = arith.constant 28 : index
    %c0_59 = arith.constant 0 : index
    %228 = vector.load %arg3[%c28, %c0_59] : memref<32x128xf32, #tpu.memory_space<vmem>>, vector<1x128xf32>
    %229 = vector.broadcast %227 : vector<8x1xf32> to vector<8x128xf32>
    %230 = vector.broadcast %228 : vector<1x128xf32> to vector<8x128xf32>
    %231 = arith.mulf %229, %230 : vector<8x128xf32>
    %cst_60 = arith.constant 1.000000e+00 : f32
    %232 = vector.broadcast %cst_60 : f32 to vector<8x128xf32>
    %233 = arith.subf %232, %231 : vector<8x128xf32>
    %234 = arith.mulf %226, %233 : vector<8x128xf32>
    %235 = vector.extract_strided_slice %0 {offsets = [0, 29], sizes = [8, 1], strides = [1, 1]} : vector<8x32xf32> to vector<8x1xf32>
    %c29 = arith.constant 29 : index
    %c0_61 = arith.constant 0 : index
    %236 = vector.load %arg3[%c29, %c0_61] : memref<32x128xf32, #tpu.memory_space<vmem>>, vector<1x128xf32>
    %237 = vector.broadcast %235 : vector<8x1xf32> to vector<8x128xf32>
    %238 = vector.broadcast %236 : vector<1x128xf32> to vector<8x128xf32>
    %239 = arith.mulf %237, %238 : vector<8x128xf32>
    %cst_62 = arith.constant 1.000000e+00 : f32
    %240 = vector.broadcast %cst_62 : f32 to vector<8x128xf32>
    %241 = arith.subf %240, %239 : vector<8x128xf32>
    %242 = arith.mulf %234, %241 : vector<8x128xf32>
    %243 = vector.extract_strided_slice %0 {offsets = [0, 30], sizes = [8, 1], strides = [1, 1]} : vector<8x32xf32> to vector<8x1xf32>
    %c30 = arith.constant 30 : index
    %c0_63 = arith.constant 0 : index
    %244 = vector.load %arg3[%c30, %c0_63] : memref<32x128xf32, #tpu.memory_space<vmem>>, vector<1x128xf32>
    %245 = vector.broadcast %243 : vector<8x1xf32> to vector<8x128xf32>
    %246 = vector.broadcast %244 : vector<1x128xf32> to vector<8x128xf32>
    %247 = arith.mulf %245, %246 : vector<8x128xf32>
    %cst_64 = arith.constant 1.000000e+00 : f32
    %248 = vector.broadcast %cst_64 : f32 to vector<8x128xf32>
    %249 = arith.subf %248, %247 : vector<8x128xf32>
    %250 = arith.mulf %242, %249 : vector<8x128xf32>
    %251 = vector.extract_strided_slice %0 {offsets = [0, 31], sizes = [8, 1], strides = [1, 1]} : vector<8x32xf32> to vector<8x1xf32>
    %c31 = arith.constant 31 : index
    %c0_65 = arith.constant 0 : index
    %252 = vector.load %arg3[%c31, %c0_65] : memref<32x128xf32, #tpu.memory_space<vmem>>, vector<1x128xf32>
    %253 = vector.broadcast %251 : vector<8x1xf32> to vector<8x128xf32>
    %254 = vector.broadcast %252 : vector<1x128xf32> to vector<8x128xf32>
    %255 = arith.mulf %253, %254 : vector<8x128xf32>
    %cst_66 = arith.constant 1.000000e+00 : f32
    %256 = vector.broadcast %cst_66 : f32 to vector<8x128xf32>
    %257 = arith.subf %256, %255 : vector<8x128xf32>
    %258 = arith.mulf %250, %257 : vector<8x128xf32>
    %259 = math.log %258 : vector<8x128xf32>
    %260 = arith.addf %1, %259 : vector<8x128xf32>
    %cst_67 = arith.constant -1.000000e+00 : f32
    %261 = vector.broadcast %cst_67 : f32 to vector<8x128xf32>
    %262 = arith.addf %261, %260 : vector<8x128xf32>
    %cst_68 = arith.constant -1.000000e+00 : f32
    %263 = vector.broadcast %cst_68 : f32 to vector<8x128xf32>
    %264 = arith.divf %263, %262 : vector<8x128xf32>
    %cst_69 = arith.constant 1.000000e+00 : f32
    %265 = vector.broadcast %cst_69 : f32 to vector<8x128xf32>
    %266 = arith.subf %265, %264 : vector<8x128xf32>
    %c0_70 = arith.constant 0 : index
    %c0_71 = arith.constant 0 : index
    %267 = vector.load %arg4[%c0_70, %c0_71] : memref<8x128xf32, #tpu.memory_space<vmem>>, vector<8x128xf32>
    tpu.vector_store %arg4[%c0_70, %c0_71], %266 {strides = array<i32>} : memref<8x128xf32, #tpu.memory_space<vmem>>, vector<8x128xf32>,
    return
  }
  func.func @transform_0(%arg0: i32, %arg1: i32) -> (i32, i32) {
    %c0_i32 = arith.constant 0 : i32
    %c0_i32_0 = arith.constant 0 : i32
    return %arg0, %c0_i32 : i32, i32
  }
  func.func @transform_1(%arg0: i32, %arg1: i32) -> (i32, i32) {
    %c0_i32 = arith.constant 0 : i32
    %c0_i32_0 = arith.constant 0 : i32
    return %c0_i32, %arg1 : i32, i32
  }
  func.func @transform_2(%arg0: i32, %arg1: i32) -> (i32, i32) {
    %c0_i32 = arith.constant 0 : i32
    return %arg0, %arg1 : i32, i32
  }
}

</mosaic_0001>

<bundles_post_ra>
// kernel: tpu_custom_call.1
= control target key start
LH: loop header
LB: loop body
LE: loop exit
PB: predicated region body
PF: predicated region fallthrough
CT: control target
= control target key end

     0   :  { %7 = vsyncpa [#allocation3], 0  ;;  %s1187_s0 = inlined_call_operand.hbm [shape: f32[16,32], index: 0, kind: input, shape index: {}]   ;;  %s1188_s1 = inlined_call_operand.hbm [shape: f32[32,128], index: 1, kind: input, shape index: {}]   ;;  %s1189_s2 = inlined_call_operand.hbm [shape: f32[16,128], index: 2, kind: output, shape index: {}]  }
   0x1   :  { %9 = vsyncpa [#allocation3 + $0x1], 0 }
   0x2   :  { %10 = vsyncpa [#allocation6], 0 }
   0x3   :  { %11 = vsyncpa [#allocation4], 0 }
   0x4   :  { %13 = vsyncpa [#allocation4 + $0x1], 0  ;;  %s1006_s9 = smov 0   ;;  %s1008_s10 = smov 0  }
   0x5   :  { %s1010_s11 = smov 0   ;;  %s1012_s12 = smov 0  }
   0x6   :  { %s1014_s13 = smov 0   ;;  %s1016_s14 = smov 0  }
   0x7 LB: > { %s617_s15 = sadd.s32 4294967295, %s954_s14   ;;  %p619_p0 = scmp.ge.s32.totalorder %s954_s14, 1  ;;  %s954_s14 = sphi %s1016_s14, %s19_s14   ;;  %s950_s13 = sphi %s1014_s13, %s1200_s13   ;;  %s946_s12 = sphi %s1012_s12, %s1199_s12   ;;  %s942_s11 = sphi %s1010_s11, %s1198_s11   ;;  %s938_s10 = sphi %s1008_s10, %s1197_s10   ;;  %s934_s9 = sphi %s1006_s9, %s1196_s9  }
   0x8   : > { %p1038_p1 = scmp.eq.s32.totalorder %s617_s15, 0  ;;  %p116_p2 = scmp.lt.s32.totalorder %s954_s14, 3 }
   0x9   : > { %s129_s19 = sshll.u32 %s1188_s1, 4  ;;  %s956_s21 = smov [#allocation5]   ;;  %s130_s19 = int_to_ptr.hbm [resolvable:$true] %s129_s19 }
   0xa   : > { %p1046_p3 = pnand %p619_p0, %p116_p2  ;;  %s131_s22 = sshll.u32 %s956_s21, 4  ;;  %s132_s22 = int_to_ptr.vmem [resolvable:$true] %s131_s22 }
   0xb   : > { %p621_p6 = scmp.ge.s32.totalorder %s954_s14, 2  ;;  %s957_s23 = smov 128  }
   0xc   : > { %p640_p4 = pneg %p1046_p3  ;;  %s958_s24 = smov 8  }
   0xd   : > { %s618_s25 = sadd.s32 4294967294, %s954_s14   ;;  %s31_s26 = sadd.s32 1, %s950_s13 }
   0xe   : > { %p641_p5 = pnand %p640_p4, %p1038_p1  ;;  %s38_s27 = sadd.s32 1, %s942_s11 }
   0xf   : > { %p33_p7 = scmp.ge.s32.totalorder %s31_s26, 2  ;;  %p45_p8 = scmp.ne.s32.totalorder %s942_s11, %s938_s10 }
  0x10   : > { %643 = dma.hbm_to_vmem [thread:$0]  (!%p641_p5), %s130_s19, 512, %s132_s22, [#allocation6], %s957_s23, %s957_s23, %s958_s24  }
  0x11   : > { %p46_p9 = scmp.eq.s32.totalorder %s954_s14, 0  ;;  %p51_p10 = scmp.ne.s32.totalorder %s938_s10, %s934_s9 }
  0x12   : > { %s1202_s26 = smov (%p33_p7, %s31_s26), 0  ;;  %p103_p13 = scmp.eq.s32.totalorder %s617_s15, 1 }
  0x13   : > { %p1065_p11 = por %p46_p9, %p45_p8  ;;  %p1071_p12 = por %p1038_p1, %p51_p10 }
  0x14   : > { %s35_s30 = ssub.s32 %s950_s13, %s1202_s26  ;;  %p109_p2 = scmp.eq.s32.totalorder %s618_s25, 1 }
  0x15   : > { %p36_p0 = scmp.eq.s32.totalorder %s35_s30, 0  ;;  %p1077_p4 = por %p103_p13, %p45_p8 }
  0x16   : > { %p653_p5 = scmp.lt.s32.totalorder %s954_s14, 2  ;;  %p1085_p7 = por %p109_p2, %p51_p10 }
  0x17   : > { %s1083_s4 = scalar_select %p36_p0, %s942_s11, %s38_s27  }
  0x18   : > { %s145_s6 = sand.u32 1, %s942_s11   ;;  %s623_s8 = sshll.u32 %s950_s13, 3 }
  0x19   : > { %s622_s7 = sshll.u32 %s145_s6, 3  ;;  %s153_s15 = scalar_lea.hbm %s1187_s0, %s623_s8 }
  0x1a   : > { %s149_s19 = scalar_lea.vmem [#allocation2], %s622_s7  ;;  %s155_s22 = sshll.u32 %s153_s15, 4  ;;  %s156_s22 = int_to_ptr.hbm [resolvable:$true] %s155_s22 }
  0x1b   : > { %s157_s21 = sshll.u32 %s149_s19, 4  ;;  %p645_p8 = pnand %p653_p5, %p1065_p11  ;;  %s158_s21 = int_to_ptr.vmem [resolvable:$true] %s157_s21 }
  0x1c   : > { %s146_s23 = scalar_lea.sflag [#allocation3], %s145_s6  ;;  %166 = sbr.rel (%p1046_p3) target bundleno = 302 (0x12e), region = 28 }
  0x1d   : > { %647 = dma.hbm_to_vmem [thread:$0]  (!%p645_p8), %s156_s22, 128, %s158_s21, %s146_s23  }
  0x1e   : > { %s1099_s24 = sand.u32 (!%p1046_p3), 1, %s938_s10  }
  0x1f   : > { %s625_s25 = sshll.u32 (!%p1046_p3), %s1099_s24, 3  ;;  %s169_s27 = scalar_lea.sflag (!%p1046_p3), [#allocation3], %s1099_s24 }
  0x20   : > { %s172_s30 = scalar_lea.vmem (!%p1046_p3), [#allocation2], %s625_s25 }
  0x21   : > { %921 = dma.done.wait (%p1071_p12), %s169_s27, 128  }
  0x22   : > { %923 = vsyncadd (%p1071_p12), %s169_s27, 4294967168 }
  0x23   : > { %925 = dma.done.wait (%p1038_p1), [#allocation6], 512  }
  0x24   : > { %927 = vsyncadd (%p1038_p1), [#allocation6], 4294966784  ;;  %v959_v0 = vmov 2   ;;  %v960_v1 = vmov 0   ;;  %v961_v2 = vmov 4   ;;  %v1113_v3 = vld [vmem:[%s172_s30] sm:$0xff] }
  0x25   : > { %741 = vset.pattern.permute.xlu1 %v959_v0  ;;  %739 = vset.pattern.permute.xlu0 %v960_v1  ;;  %v962_v4 = vmov 3   ;;  %v963_v5 = vmov 1   ;;  %v964_v6 = vmov 5   ;;  %v965_v7 = vmov 6   ;;  %v773_v37 = vld [vmem:[#allocation5] ss:$0 sm:$0xff] }
  0x26   : > { %743 = vset.pattern.permute.xlu2 %v961_v2  ;;  %220 = vperm.xlu1 %741, %v1113_v3   ;;  %v966_v8 = vmov 8   ;;  %v967_v9 = vmov 7   ;;  %v968_v10 = vmov 9   ;;  %v969_v11 = vmov 13   ;;  %v776_v39 = vld [vmem:[#allocation5 + $0x1] ss:$0 sm:$0xff] }
  0x27   : > { %203 = vperm.xlu0 %739, %v1113_v3   ;;  %238 = vperm.xlu2 %743, %v1113_v3   ;;  %v970_v12 = vmov 10   ;;  %v971_v13 = vmov 11   ;;  %v972_v14 = vmov 18   ;;  %v973_v15 = vmov 12   ;;  %v772_v40 = vld [vmem:[#allocation5 + $0x2] ss:$0 sm:$0xff] }
  0x28   : > { %v974_v16 = vmov 14   ;;  %v975_v17 = vmov 23   ;;  %v976_v18 = vmov 15   ;;  %v977_v19 = vmov 16   ;;  %v775_v47 = vld [vmem:[#allocation5 + $0x3] ss:$0 sm:$0xff] }
  0x29   : > { %v978_v20 = vmov 17   ;;  %v979_v21 = vmov 28   ;;  %v980_v22 = vmov 19   ;;  %v981_v23 = vmov 20   ;;  %v774_v51 = vld [vmem:[#allocation5 + $0x4] ss:$0 sm:$0xff] }
  0x2a   : > { %v982_v24 = vmov 31   ;;  %v983_v25 = vmov 21   ;;  %v984_v26 = vmov 22   ;;  %v985_v27 = vmov 24   ;;  %v777_v54 = vld [vmem:[#allocation5 + $0x5] ss:$0 sm:$0xff] }
  0x2b   : > { %v986_v28 = vmov 25   ;;  %v987_v29 = vmov 26   ;;  %v988_v30 = vmov 27   ;;  %v989_v31 = vmov 29   ;;  %v778_v61 = vld [vmem:[#allocation5 + $0x6] ss:$0 sm:$0xff] }
  0x2c   : > { %v990_v32 = vmov 30   ;;  %v779_v2 = vld [vmem:[#allocation5 + $0x7] ss:$0 sm:$0xff]  ;;  %s629_s16 = sshll.u32 %s946_s12, 3  ;;  %s198_s6 = scalar_lea.vmem [#allocation7], %s625_s25 }
  0x2d   : > { %s521_s29 = scalar_lea.hbm %s1189_s2, %s629_s16  ;;  %s523_s7 = sshll.u32 %s198_s6, 4  ;;  %s524_s7 = int_to_ptr.vmem [resolvable:$true] %s523_s7 }
  0x2e   : > { %742 = vset.pattern.permute.xlu1 %v962_v4  ;;  %s525_s12 = sshll.u32 %s521_s29, 4  ;;  %s510_s8 = scalar_lea.sflag [#allocation4], %s1099_s24  ;;  %s526_s12 = int_to_ptr.hbm [resolvable:$true] %s525_s12 }
  0x2f   : > { %740 = vset.pattern.permute.xlu0 %v963_v5  ;;  %229 = vperm.xlu1 %742, %v1113_v3   ;;  %s882_s17 = sshra.s32 %s526_s12, 4  ;;  %s888_s21 = scalar_lea.hbm %s1189_s2, 16  ;;  %s883_s17 = int_to_ptr.hbm [resolvable:$true] %s882_s17 }
  0x30   : > { %211 = vperm.xlu0 %740, %v1113_v3   ;;  %744 = vset.pattern.permute.xlu2 %v964_v6  ;;  %s884_s18 = scalar_lea.hbm %s883_s17, 8  ;;  %p889_p10 = scmp.lt.s32.totalorder %s883_s17, %s1189_s2 }
  0x31   : > { %247 = vperm.xlu2 %744, %v1113_v3   ;;  %p885_p1 = scmp.ne.s32.totalorder %s883_s17, %s884_s18  ;;  %p890_p11 = scmp.lt.s32.totalorder %s888_s21, %s884_s18 }
  0x33   : > { %p886_p3 = pnand %p885_p1, %p1077_p4  ;;  %p891_p12 = por %p890_p11, %p889_p10 }
  0x35   : > { %p887_p9 = pneg %p886_p3 }
  0x37   : > { %745 = vset.pattern.permute.xlu1 %v965_v7  ;;  %v780_v7 = vld [vmem:[#allocation5 + $0x8] ss:$0 sm:$0xff]  ;;  %p892_p13 = pnand %p891_p12, %p887_p9 }
  0x38   : > { %747 = vset.pattern.permute.xlu0 %v966_v8  ;;  %256 = vperm.xlu1 %745, %v1113_v3  }
  0x39   : > { %274 = vperm.xlu0 %747, %v1113_v3   ;;  %746 = vset.pattern.permute.xlu2 %v967_v9 }
  0x3a   : > { %265 = vperm.xlu2 %746, %v1113_v3  }
  0x40   : > { %748 = vset.pattern.permute.xlu1 %v968_v10  ;;  %v781_v10 = vld [vmem:[#allocation5 + $0x9] ss:$0 sm:$0xff] }
  0x41   : > { %752 = vset.pattern.permute.xlu0 %v969_v11  ;;  %283 = vperm.xlu1 %748, %v1113_v3  }
  0x42   : > { %319 = vperm.xlu0 %752, %v1113_v3   ;;  %749 = vset.pattern.permute.xlu2 %v970_v12 }
  0x43   : > { %292 = vperm.xlu2 %749, %v1113_v3  }
  0x49   : > { %750 = vset.pattern.permute.xlu1 %v971_v13 }
  0x4a   : > { %757 = vset.pattern.permute.xlu0 %v972_v14  ;;  %301 = vperm.xlu1 %750, %v1113_v3  }
  0x4b   : > { %364 = vperm.xlu0 %757, %v1113_v3   ;;  %751 = vset.pattern.permute.xlu2 %v973_v15  ;;  %v782_v15 = vld [vmem:[#allocation5 + $0xa] ss:$0 sm:$0xff] }
  0x4c   : > { %310 = vperm.xlu2 %751, %v1113_v3  }
  0x52   : > { %753 = vset.pattern.permute.xlu1 %v974_v16 }
  0x53   : > { %762 = vset.pattern.permute.xlu0 %v975_v17  ;;  %328 = vperm.xlu1 %753, %v1113_v3  }
  0x54   : > { %409 = vperm.xlu0 %762, %v1113_v3   ;;  %754 = vset.pattern.permute.xlu2 %v976_v18 }
  0x55   : > { %337 = vperm.xlu2 %754, %v1113_v3  }
  0x5b   : > { %755 = vset.pattern.permute.xlu1 %v977_v19  ;;  %v783_v19 = vld [vmem:[#allocation5 + $0xb] ss:$0 sm:$0xff] }
  0x5c   : > { %346 = vperm.xlu1 %755, %v1113_v3   ;;  %767 = vset.pattern.permute.xlu0 %v979_v21 }
  0x5d   : > { %756 = vset.pattern.permute.xlu2 %v978_v20  ;;  %454 = vperm.xlu0 %767, %v1113_v3  }
  0x5e   : > { %355 = vperm.xlu2 %756, %v1113_v3  }
  0x64   : > { %758 = vset.pattern.permute.xlu1 %v980_v22 }
  0x65   : > { %373 = vperm.xlu1 %758, %v1113_v3   ;;  %771 = vset.pattern.permute.xlu0 %v982_v24 }
  0x66   : > { %759 = vset.pattern.permute.xlu2 %v981_v23 }
  0x67   : > { %382 = vperm.xlu2 %759, %v1113_v3  }
  0x6d   : > { %760 = vset.pattern.permute.xlu1 %v983_v25  ;;  %v784_v25 = vld [vmem:[#allocation5 + $0xc] ss:$0 sm:$0xff] }
  0x6e   : > { %391 = vperm.xlu1 %760, %v1113_v3  }
  0x6f   : > { %761 = vset.pattern.permute.xlu2 %v984_v26 }
  0x70   : > { %400 = vperm.xlu2 %761, %v1113_v3  }
  0x76   : > { %763 = vset.pattern.permute.xlu1 %v985_v27 }
  0x77   : > { %418 = vperm.xlu1 %763, %v1113_v3  }
  0x78   : > { %764 = vset.pattern.permute.xlu2 %v986_v28 }
  0x79   : > { %427 = vperm.xlu2 %764, %v1113_v3  }
  0x7f   : > { %765 = vset.pattern.permute.xlu1 %v987_v29 }
  0x80   : > { %436 = vperm.xlu1 %765, %v1113_v3  }
  0x81   : > { %766 = vset.pattern.permute.xlu2 %v988_v30  ;;  %v239_v33 = vpop.permute.xlu2 %238  ;;  %v785_v30 = vld [vmem:[#allocation5 + $0xd] ss:$0 sm:$0xff] }
  0x82   : > { %445 = vperm.xlu2 %766, %v1113_v3   ;;  %v242_v56 = vmul.f32 %v774_v51, %v239_v33 }
  0x84   : > { %v243_v62 = vsub.f32 1.0, %v242_v56 }
  0x88   : > { %768 = vset.pattern.permute.xlu1 %v989_v31 }
  0x89   : > { %463 = vperm.xlu1 %768, %v1113_v3  }
  0x8a   : > { %769 = vset.pattern.permute.xlu2 %v990_v32 }
  0x8b   : > { %472 = vperm.xlu2 %769, %v1113_v3   ;;  %v248_v34 = vpop.permute.xlu2 %247 }
  0x8c   : > { %v251_v60 = vmul.f32 %v777_v54, %v248_v34  ;;  %v786_v34 = vld [vmem:[#allocation5 + $0xe] ss:$0 sm:$0xff] }
  0x8e   : > { %v252_v0 = vsub.f32 1.0, %v251_v60 }
  0x91   : > { %770 = vset.pattern.permute.xlu1 %v982_v24 }
  0x92   : > { %481 = vperm.xlu1 %770, %v1113_v3  }
  0x94   : > { %v266_v45 = vpop.permute.xlu2 %265 }
  0x95   : > { %v269_v6 = vmul.f32 %v779_v2, %v266_v45 }
  0x97   : > { %v270_v12 = vsub.f32 1.0, %v269_v6 }
  0x98   : > { %v221_v35 = vpop.permute.xlu1 %220 }
  0x99   : > { %v204_v36 = vpop.permute.xlu0 %203  ;;  %v224_v46 = vmul.f32 %v772_v40, %v221_v35  ;;  %v787_v40 = vld [vmem:[#allocation5 + $0xf] ss:$0 sm:$0xff] }
  0x9a   : > { %v207_v38 = vmul.f32 %v773_v37, %v204_v36 }
  0x9b   : > { %v225_v50 = vsub.f32 1.0, %v224_v46 }
  0x9c   : > { %v208_v43 = vsub.f32 1.0, %v207_v38 }
  0x9d   : > { %v293_v58 = vpop.permute.xlu2 %292 }
  0x9e   : > { %v296_v21 = vmul.f32 %v782_v15, %v293_v58  ;;  %v791_v58 = vld [vmem:[#allocation5 + $0x13] ss:$0 sm:$0xff]  ;;  %v795_v15 = vld [vmem:[#allocation5 + $0x17] ss:$0 sm:$0xff] }
  0xa0   : > { %v297_v27 = vsub.f32 1.0, %v296_v21 }
  0xa1   : > { %v230_v41 = vpop.permute.xlu1 %229 }
  0xa2   : > { %v212_v42 = vpop.permute.xlu0 %211  ;;  %v233_v52 = vmul.f32 %v775_v47, %v230_v41 }
  0xa3   : > { %v215_v44 = vmul.f32 %v776_v39, %v212_v42 }
  0xa4   : > { %v234_v57 = vsub.f32 1.0, %v233_v52 }
  0xa5   : > { %v216_v48 = vsub.f32 1.0, %v215_v44 }
  0xa6   : > { %v311_v9 = vpop.permute.xlu2 %310 }
  0xa7   : > { %v217_v49 = vmul.f32 %v216_v48, %v208_v43  ;;  %v314_v29 = vmul.f32 %v784_v25, %v311_v9  ;;  %v788_v43 = vld [vmem:[#allocation5 + $0x10] ss:$0 sm:$0xff]  ;;  %v797_v25 = vld [vmem:[#allocation5 + $0x19] ss:$0 sm:$0xff] }
  0xa9   : > { %v226_v53 = vmul.f32 %v225_v50, %v217_v49  ;;  %v315_v36 = vsub.f32 1.0, %v314_v29  ;;  %v789_v49 = vld [vmem:[#allocation5 + $0x11] ss:$0 sm:$0xff] }
  0xaa   : > { %v257_v55 = vpop.permute.xlu1 %256 }
  0xab   : > { %v235_v59 = vmul.f32 %v234_v57, %v226_v53  ;;  %v260_v1 = vmul.f32 %v778_v61, %v257_v55  ;;  %v275_v8 = vpop.permute.xlu0 %274  ;;  %v790_v55 = vld [vmem:[#allocation5 + $0x12] ss:$0 sm:$0xff] }
  0xac   : > { %v278_v13 = vmul.f32 %v780_v7, %v275_v8 }
  0xad   : > { %v244_v63 = vmul.f32 %v243_v62, %v235_v59  ;;  %v261_v5 = vsub.f32 1.0, %v260_v1 }
  0xae   : > { %v279_v18 = vsub.f32 1.0, %v278_v13 }
  0xaf   : > { %v253_v4 = vmul.f32 %v252_v0, %v244_v63  ;;  %v338_v22 = vpop.permute.xlu2 %337  ;;  %v792_v0 = vld [vmem:[#allocation5 + $0x14] ss:$0 sm:$0xff] }
  0xb0   : > { %v341_v46 = vmul.f32 %v787_v40, %v338_v22  ;;  %v800_v40 = vld [vmem:[#allocation5 + $0x1c] ss:$0 sm:$0xff] }
  0xb1   : > { %v262_v11 = vmul.f32 %v261_v5, %v253_v4 }
  0xb2   : > { %v342_v51 = vsub.f32 1.0, %v341_v46 }
  0xb3   : > { %v284_v3 = vpop.permute.xlu1 %283  ;;  %v271_v17 = vmul.f32 %v270_v12, %v262_v11 }
  0xb4   : > { %v287_v14 = vmul.f32 %v781_v10, %v284_v3  ;;  %v320_v32 = vpop.permute.xlu0 %319  ;;  %v793_v3 = vld [vmem:[#allocation5 + $0x15] ss:$0 sm:$0xff]  ;;  %v794_v10 = vld [vmem:[#allocation5 + $0x16] ss:$0 sm:$0xff] }
  0xb5   : > { %v280_v23 = vmul.f32 %v279_v18, %v271_v17  ;;  %v323_v37 = vmul.f32 %v785_v30, %v320_v32  ;;  %v796_v18 = vld [vmem:[#allocation5 + $0x18] ss:$0 sm:$0xff]  ;;  %v798_v30 = vld [vmem:[#allocation5 + $0x1a] ss:$0 sm:$0xff]  ;;  %v799_v32 = vld [vmem:[#allocation5 + $0x1b] ss:$0 sm:$0xff] }
  0xb6   : > { %v288_v20 = vsub.f32 1.0, %v287_v14 }
  0xb7   : > { %v324_v42 = vsub.f32 1.0, %v323_v37 }
  0xb8   : > { %v289_v26 = vmul.f32 %v288_v20, %v280_v23  ;;  %v356_v38 = vpop.permute.xlu2 %355 }
  0xb9   : > { %v359_v54 = vmul.f32 %v789_v49, %v356_v38 }
  0xba   : > { %v298_v33 = vmul.f32 %v297_v27, %v289_v26 }
  0xbb   : > { %v360_v61 = vsub.f32 1.0, %v359_v54 }
  0xbc   : > { %v302_v16 = vpop.permute.xlu1 %301 }
  0xbd   : > { %v305_v24 = vmul.f32 %v783_v19, %v302_v16  ;;  %v365_v56 = vpop.permute.xlu0 %364 }
  0xbe   : > { %v368_v62 = vmul.f32 %v790_v55, %v365_v56  ;;  %v803_v56 = vld [vmem:[#allocation5 + $0x1f] ss:$0 sm:$0xff] }
  0xbf   : > { %v306_v28 = vsub.f32 1.0, %v305_v24 }
  0xc0   : > { %v369_v2 = vsub.f32 1.0, %v368_v62 }
  0xc1   : > { %v307_v35 = vmul.f32 %v306_v28, %v298_v33  ;;  %v383_v52 = vpop.permute.xlu2 %382 }
  0xc2   : > { %v386_v6 = vmul.f32 %v792_v0, %v383_v52 }
  0xc3   : > { %v316_v41 = vmul.f32 %v315_v36, %v307_v35 }
  0xc4   : > { %v387_v12 = vsub.f32 1.0, %v386_v6 }
  0xc5   : > { %v329_v31 = vpop.permute.xlu1 %328  ;;  %v325_v47 = vmul.f32 %v324_v42, %v316_v41 }
  0xc6   : > { %v332_v39 = vmul.f32 %v786_v34, %v329_v31  ;;  %v410_v16 = vpop.permute.xlu0 %409 }
  0xc7   : > { %v413_v22 = vmul.f32 %v795_v15, %v410_v16 }
  0xc8   : > { %v333_v45 = vsub.f32 1.0, %v332_v39 }
  0xc9   : > { %v414_v27 = vsub.f32 1.0, %v413_v22 }
  0xca   : > { %v334_v50 = vmul.f32 %v333_v45, %v325_v47  ;;  %v401_v4 = vpop.permute.xlu2 %400 }
  0xcb   : > { %v404_v14 = vmul.f32 %v794_v10, %v401_v4 }
  0xcc   : > { %v343_v57 = vmul.f32 %v342_v51, %v334_v50 }
  0xcd   : > { %v405_v21 = vsub.f32 1.0, %v404_v14 }
  0xce   : > { %v347_v44 = vpop.permute.xlu1 %346 }
  0xcf   : > { %v350_v48 = vmul.f32 %v788_v43, %v347_v44  ;;  %v455_v41 = vpop.permute.xlu0 %454  ;;  %v801_v43 = vld [vmem:[#allocation5 + $0x1d] ss:$0 sm:$0xff] }
  0xd0   : > { %v458_v46 = vmul.f32 %v800_v40, %v455_v41 }
  0xd1   : > { %v351_v53 = vsub.f32 1.0, %v350_v48  ;;  %v802_v48 = vld [vmem:[#allocation5 + $0x1e] ss:$0 sm:$0xff] }
  0xd2   : > { %v459_v52 = vsub.f32 1.0, %v458_v46 }
  0xd3   : > { %v352_v60 = vmul.f32 %v351_v53, %v343_v57  ;;  %v428_v19 = vpop.permute.xlu2 %427 }
  0xd4   : > { %v431_v29 = vmul.f32 %v797_v25, %v428_v19 }
  0xd5   : > { %v361_v1 = vmul.f32 %v360_v61, %v352_v60 }
  0xd6   : > { %v432_v36 = vsub.f32 1.0, %v431_v29 }
  0xd7   : > { %v374_v59 = vpop.permute.xlu1 %373  ;;  %v370_v8 = vmul.f32 %v369_v2, %v361_v1 }
  0xd8   : > { %v377_v63 = vmul.f32 %v791_v58, %v374_v59 }
  0xda   : > { %v378_v5 = vsub.f32 1.0, %v377_v63 }
  0xdc   : > { %v379_v11 = vmul.f32 %v378_v5, %v370_v8  ;;  %v446_v34 = vpop.permute.xlu2 %445 }
  0xdd   : > { %v449_v39 = vmul.f32 %v799_v32, %v446_v34 }
  0xde   : > { %v388_v17 = vmul.f32 %v387_v12, %v379_v11 }
  0xdf   : > { %v450_v45 = vsub.f32 1.0, %v449_v39 }
  0xe0   : > { %v392_v7 = vpop.permute.xlu1 %391 }
  0xe1   : > { %v395_v9 = vmul.f32 %v793_v3, %v392_v7 }
  0xe3   : > { %v396_v13 = vsub.f32 1.0, %v395_v9 }
  0xe5   : > { %v397_v20 = vmul.f32 %v396_v13, %v388_v17  ;;  %v473_v50 = vpop.permute.xlu2 %472 }
  0xe6   : > { %v476_v54 = vmul.f32 %v802_v48, %v473_v50 }
  0xe7   : > { %v406_v26 = vmul.f32 %v405_v21, %v397_v20 }
  0xe8   : > { %v477_v58 = vsub.f32 1.0, %v476_v54 }
  0xe9   : > { %v419_v23 = vpop.permute.xlu1 %418  ;;  %v415_v31 = vmul.f32 %v414_v27, %v406_v26 }
  0xea   : > { %v422_v24 = vmul.f32 %v796_v18, %v419_v23 }
  0xec   : > { %v423_v28 = vsub.f32 1.0, %v422_v24 }
  0xee   : > { %v424_v35 = vmul.f32 %v423_v28, %v415_v31 }
  0xf0   : > { %v433_v42 = vmul.f32 %v432_v36, %v424_v35 }
  0xf2   : > { %v437_v33 = vpop.permute.xlu1 %436 }
  0xf3   : > { %v440_v37 = vmul.f32 %v798_v30, %v437_v33 }
  0xf5   : > { %v441_v38 = vsub.f32 1.0, %v440_v37 }
  0xf7   : > { %v442_v44 = vmul.f32 %v441_v38, %v433_v42 }
  0xf9   : > { %v451_v51 = vmul.f32 %v450_v45, %v442_v44 }
  0xfb   : > { %v464_v47 = vpop.permute.xlu1 %463  ;;  %v460_v55 = vmul.f32 %v459_v52, %v451_v51 }
  0xfc   : > { %v467_v49 = vmul.f32 %v801_v43, %v464_v47 }
  0xfe   : > { %v468_v53 = vsub.f32 1.0, %v467_v49 }
 0x100   : > { %v469_v57 = vmul.f32 %v468_v53, %v460_v55 }
 0x102   : > { %v478_v61 = vmul.f32 %v477_v58, %v469_v57 }
 0x104   : > { %v482_v59 = vpop.permute.xlu1 %481 }
 0x105   : > { %v485_v60 = vmul.f32 %v803_v56, %v482_v59 }
 0x107   : > { %v486_v62 = vsub.f32 1.0, %v485_v60 }
 0x109   : > { %v487_v63 = vmul.f32 %v486_v62, %v478_v61 }
 0x10b   : > { %804 = vlog2.f32 %v487_v63 }
 0x111   : > { %v805_v0 = vpop.eup %804 }
 0x112   : > { %v489_v1 = vmul.f32 0.6931472, %v805_v0 }
 0x114   : > { %v491_v2 = vadd.f32 -1.0, %v489_v1 }
 0x116   : > { %806 = vrcp.f32 %v491_v2  ;;  %v503_v6 = vand.u32 2147483648, %v491_v2  ;;  %v501_v8 = vand.u32 2147483647, %v491_v2  ;;  %vm497_vm1 = vweird.f32 %v491_v2 }
 0x118   : > { %v504_v10 = vor.u32 1.1754944e-38, %v503_v6  ;;  %vm502_vm3 = vcmp.eq.f32.partialorder %v501_v8, 8.507059e+37 }
 0x11c   : > { %v807_v3 = vpop.eup %806 }
 0x11d   : > { %v493_v4 = vmul.f32 %v807_v3, %v491_v2  ;;  %vm498_vm0 = vweird.f32 %v807_v3 }
 0x11e   : > { %vm499_vm2 = vmor %vm497_vm1, %vm498_vm0 }
 0x11f   : > { %v494_v5 = vsub.f32 1.0, %v493_v4 }
 0x121   : > { %v495_v7 = vmul.f32 %v807_v3, %v494_v5 }
 0x123   : > { %v496_v9 = vadd.f32 %v807_v3, %v495_v7 }
 0x125   : > { %v500_v11 = vsel %vm499_vm2, %v807_v3, %v496_v9 }
 0x126   : > { %v505_v12 = vsel %vm502_vm3, %v504_v10, %v500_v11 }
 0x127   : > { %v506_v13 = vmul.f32 -1.0, %v505_v12 }
 0x129   : > { %v507_v14 = vsub.f32 1.0, %v506_v13 }
 0x12b   : > { %508 = vst [vmem:[%s198_s6] sm:$0xff] %v507_v14 }
 0x12c   : > { %895 = shalt.err (!%p892_p13)
}
 0x12d   : > { %638 = dma.vmem_to_hbm [thread:$0]  (%p1077_p4), %s524_s7, 128, %s526_s12, %s510_s8  }
 0x12e PF: > { %s537_s24 = sand.u32 1, %s934_s9   ;;  %p649_p0 = pnand %p621_p6, %p1085_p7 }
 0x12f   : > { %s538_s25 = scalar_lea.sflag [#allocation4], %s537_s24 }
 0x130   : > { %p650_p2 = pneg %p649_p0 }
 0x132   : > { %929 = dma.done.wait (%p650_p2), %s538_s25, 128  }
 0x133   : > { %931 = vsyncadd (%p650_p2), %s538_s25, 4294967168  ;;  %s19_s14 = sadd.s32 1, %s954_s14   ;;  %s1196_s9 = smov %s938_s10 }
 0x134   : > { %p16_p5 = scmp.ge.s32.totalorder %s19_s14, 4   ;;  %s1197_s10 = smov %s942_s11 }
 0x135   : > { %s1198_s11 = smov %s1083_s4  ;;  %s1199_s12 = smov %s950_s13 }
 0x136   : > { %s1200_s13 = smov %s1202_s26  ;;  %18 = sbr.rel (!%p16_p5) target bundleno = 7 (0x7), region = 78 }
 0x13b   :  { %544 = vsyncpa [#allocation3], 1 }
 0x13c   :  { %546 = vsyncpa [#allocation3 + $0x1], 1 }
 0x13d   :  { %547 = vsyncpa [#allocation6], 1 }
 0x13e   :  { %548 = vsyncpa [#allocation4], 1 }
 0x13f   :  { %550 = vsyncpa [#allocation4 + $0x1], 1 }

</bundles_post_ra>
